<compile_context>
chip_gen: v7x
topology: tpu7x:2x2x1
jax: 0.10.0
libtpu: 0.0.40
codegen_flags: <defaults>
</compile_context>

<pallas_src>
import functools

import jax
import jax.numpy as jnp
from jax.experimental import pallas as pl
from jax.experimental.pallas import tpu as pltpu

LANE = 128        # lane width -> lane-dense K / N
SUB = 16          # sublane granularity for bf16 row tiles
NEG_SLOPE = 0.2
OUT_ROWS = 8      # padded per-block logit rows (sublane-aligned)
VMEM_LIMIT = 32 * 1024 * 1024  # safe on v5e/v6e (128 MiB) and v7x (64 MiB physical)


def _round_up(x, m):
    return (x + m - 1) // m * m


def _pad2d(x, rows, cols):
    r, c = x.shape
    return jnp.pad(x, ((0, rows - r), (0, cols - c)))


# ---------------------------------------------------------------------------
# Kernel 1: conv block = (patches @ W_folded) + shift, LeakyReLU(0.2)
# ---------------------------------------------------------------------------
def _conv_block_kernel(x_ref, w_ref, shift_ref, o_ref):
    acc = jnp.dot(x_ref[...], w_ref[...], preferred_element_type=jnp.float32)
    y = acc + shift_ref[...]                       # folded-BN shift (f32 epilogue)
    y = jnp.where(y > 0, y, NEG_SLOPE * y)         # LeakyReLU(0.2)
    o_ref[...] = y.astype(o_ref.dtype)


def conv_block_matmul(patches, w, shift, *, tile_m=512, out_dtype=jnp.bfloat16):
    """patches: (M, Kp) bf16, Kp%128==0;  w: (Kp, Np) bf16, Np%128==0;  shift: (1, Np) f32."""
    M, Kp = patches.shape
    _, Np = w.shape
    tm = min(tile_m, _round_up(M, SUB))
    Mp = _round_up(M, tm)
    if Mp != M:
        patches = jnp.pad(patches, ((0, Mp - M), (0, 0)))
    grid = (Mp // tm,)
    cost = pl.CostEstimate(
        flops=2 * Mp * Kp * Np,
        transcendentals=0,
        bytes_accessed=(Mp * Kp * 2 + Kp * Np * 2 + Np * 4
                        + Mp * Np * jnp.dtype(out_dtype).itemsize),
    )
    out = pl.pallas_call(
        _conv_block_kernel,
        out_shape=jax.ShapeDtypeStruct((Mp, Np), out_dtype),
        grid=grid,
        in_specs=[
            pl.BlockSpec((tm, Kp), lambda i: (i, 0)),   # row tile (pipelined)
            pl.BlockSpec((Kp, Np), lambda i: (0, 0)),   # weights resident
            pl.BlockSpec((1, Np), lambda i: (0, 0)),    # shift resident
        ],
        out_specs=pl.BlockSpec((tm, Np), lambda i: (i, 0)),
        compiler_params=pltpu.CompilerParams(
            dimension_semantics=("parallel",),
            vmem_limit_bytes=VMEM_LIMIT,
        ),
        cost_estimate=cost,
    )(patches, w, shift)
    return out[:M]


# ---------------------------------------------------------------------------
# Kernel 2: last conv block fused with Flatten + Dropout(eval) + Linear
#   conv:   y = LeakyReLU(patches @ W + shift)                  (tm, Np)
#   linear: logit[b] = sum_{s,c} y[b*S+s, c] * Wlin[s, c] + b   (per image)
# ---------------------------------------------------------------------------
def _conv_linear_kernel(x_ref, w_ref, shift_ref, wlin_ref, sel_ref, bias_ref, o_ref):
    acc = jnp.dot(x_ref[...], w_ref[...], preferred_element_type=jnp.float32)
    y = acc + shift_ref[...]
    y = jnp.where(y > 0, y, NEG_SLOPE * y)         # last conv activations (tm, Np) f32
    # TODO(synk): nn.Dropout(p=0.4) is stochastic in train mode; eval-mode identity here.
    z = y * wlin_ref[...]                          # Linear weights folded elementwise
    g = jnp.dot(sel_ref[...], z, preferred_element_type=jnp.float32)  # (OUT_ROWS, Np) per-image sums
    logit = jnp.sum(g, axis=-1, keepdims=True)     # (OUT_ROWS, 1)
    o_ref[...] = (logit + bias_ref[...]).astype(o_ref.dtype)          # lane-dense (OUT_ROWS, 128)


def conv_linear_fused(patches, w, shift, wlin_tile, sel, bias_row, *, spatial, batch_tile):
    M, Kp = patches.shape
    _, Np = w.shape
    tm = batch_tile * spatial
    B = M // spatial
    nblk = pl.cdiv(B, batch_tile)
    Mp = nblk * tm
    if Mp != M:
        patches = jnp.pad(patches, ((0, Mp - M), (0, 0)))
    cost = pl.CostEstimate(
        flops=2 * Mp * Kp * Np + 2 * nblk * OUT_ROWS * tm * Np,
        transcendentals=0,
        bytes_accessed=(Mp * Kp * 2 + Kp * Np * 2 + tm * Np * 4
                        + OUT_ROWS * tm * 4 + nblk * OUT_ROWS * LANE * 4),
    )
    out = pl.pallas_call(
        _conv_linear_kernel,
        out_shape=jax.ShapeDtypeStruct((nblk * OUT_ROWS, LANE), jnp.float32),
        grid=(nblk,),
        in_specs=[
            pl.BlockSpec((tm, Kp), lambda i: (i, 0)),        # batch-block of patches
            pl.BlockSpec((Kp, Np), lambda i: (0, 0)),        # conv weights resident
            pl.BlockSpec((1, Np), lambda i: (0, 0)),         # shift resident
            pl.BlockSpec((tm, Np), lambda i: (0, 0)),        # tiled Linear weights resident
            pl.BlockSpec((OUT_ROWS, tm), lambda i: (0, 0)),  # per-image row selector resident
            pl.BlockSpec((1, LANE), lambda i: (0, 0)),       # bias row
        ],
        out_specs=pl.BlockSpec((OUT_ROWS, LANE), lambda i: (i, 0)),
        compiler_params=pltpu.CompilerParams(
            dimension_semantics=("parallel",),
            vmem_limit_bytes=VMEM_LIMIT,
        ),
        cost_estimate=cost,
    )(patches, w, shift, wlin_tile, sel, bias_row)
    logits = out.reshape(nblk, OUT_ROWS, LANE)[:, :batch_tile, 0].reshape(nblk * batch_tile)
    return logits[:B].reshape(B, 1)


# ---------------------------------------------------------------------------
# Glue: im2col for Conv2d(kernel=4, stride=2, padding=1, bias=False)  (XLA, bf16)
# ---------------------------------------------------------------------------
def im2col(x_nhwc, kh=4, kw=4, stride=2, pad=1):
    B, H, W, C = x_nhwc.shape
    xp = jnp.pad(x_nhwc, ((0, 0), (pad, pad), (pad, pad), (0, 0)))
    Ho = (H + 2 * pad - kh) // stride + 1
    Wo = (W + 2 * pad - kw) // stride + 1
    cols = []
    for i in range(kh):
        for j in range(kw):
            cols.append(xp[:, i:i + stride * Ho:stride, j:j + stride * Wo:stride, :])
    patches = jnp.stack(cols, axis=3)                       # (B, Ho, Wo, KH*KW, C)
    return patches.reshape(B * Ho * Wo, kh * kw * C), Ho, Wo


# ---------------------------------------------------------------------------
# Deterministic parameter init (PyTorch shapes; eval-mode BN folded into weights)
# ---------------------------------------------------------------------------
def init_params(key, discriminator_filters, num_layers):
    keys = jax.random.split(key, 8 * num_layers)
    ki = 0
    convs = []
    in_ch = 3
    for layer in range(num_layers - 1):
        out_ch = discriminator_filters * (2 ** layer)
        # PyTorch conv weight (Cout, Cin, KH, KW) -> (KH*KW*Cin, Cout)
        w = 0.05 * jax.random.normal(keys[ki], (out_ch, in_ch, 4, 4), jnp.float32); ki += 1
        w2d = jnp.transpose(w, (2, 3, 1, 0)).reshape(4 * 4 * in_ch, out_ch)
        if layer == 0:
            scale = jnp.ones((out_ch,), jnp.float32)
            shift = jnp.zeros((out_ch,), jnp.float32)
        else:  # eval-mode BatchNorm2d folded into per-channel scale/shift
            gamma = 1.0 + 0.1 * jax.random.normal(keys[ki], (out_ch,), jnp.float32); ki += 1
            beta = 0.1 * jax.random.normal(keys[ki], (out_ch,), jnp.float32); ki += 1
            mean = 0.1 * jax.random.normal(keys[ki], (out_ch,), jnp.float32); ki += 1
            var = jnp.abs(1.0 + 0.1 * jax.random.normal(keys[ki], (out_ch,), jnp.float32)); ki += 1
            scale = gamma / jnp.sqrt(var + 1e-5)
            shift = beta - mean * scale
        w2d = w2d * scale[None, :]                           # fold BN scale into the weights
        Kp = _round_up(w2d.shape[0], LANE)
        Np = _round_up(out_ch, LANE)
        convs.append({
            "w": _pad2d(w2d, Kp, Np).astype(jnp.bfloat16),   # lane-dense, MXU-ready
            "shift": _pad2d(shift.reshape(1, out_ch), 1, Np),
            "out_ch": out_ch,
        })
        in_ch = out_ch

    feat_dim = discriminator_filters * (2 ** (num_layers - 2)) * 4 * 4
    lin_w = 0.05 * jax.random.normal(keys[ki], (feat_dim, 1), jnp.float32); ki += 1
    lin_b = 0.05 * jax.random.normal(keys[ki], (1,), jnp.float32); ki += 1
    return {"convs": convs, "lin_w": lin_w, "lin_b": lin_b, "feat_dim": feat_dim}


# ---------------------------------------------------------------------------
# Forward pass
# ---------------------------------------------------------------------------
def discriminator_forward(x_nchw, params):
    x = jnp.transpose(x_nchw, (0, 2, 3, 1)).astype(jnp.bfloat16)   # NCHW -> NHWC, bf16
    B = x.shape[0]
    convs = params["convs"]
    n_conv = len(convs)

    # all conv blocks except the last: fused matmul + shift + LeakyReLU
    for layer in range(n_conv - 1):
        c = convs[layer]
        patches, Ho, Wo = im2col(x)
        Kp = c["w"].shape[0]
        patches = jnp.pad(patches, ((0, 0), (0, Kp - patches.shape[1])))
        y = conv_block_matmul(patches, c["w"], c["shift"])          # (M, Np) bf16
        x = y[:, :c["out_ch"]].reshape(B, Ho, Wo, c["out_ch"])

    # last conv block fused with Flatten + Dropout(eval) + Linear
    c = convs[-1]
    patches, Ho, Wo = im2col(x)
    spatial = Ho * Wo                                               # 4*4 per module's Linear sizing
    Kp, Np = c["w"].shape
    patches = jnp.pad(patches, ((0, 0), (0, Kp - patches.shape[1])))

    out_ch = c["out_ch"]
    # PyTorch flattens NCHW -> (c, h, w) order; reorder Linear rows to our (h*w, c) layout
    wlin_hw_c = params["lin_w"].reshape(out_ch, spatial).T          # (spatial, out_ch)
    wlin_hw_c = _pad2d(wlin_hw_c, spatial, Np)                      # (spatial, Np) f32
    batch_tile = min(B, OUT_ROWS)
    wlin_tile = jnp.tile(wlin_hw_c, (batch_tile, 1))                # (batch_tile*spatial, Np)
    sel = (jnp.arange(OUT_ROWS)[:, None]
           == (jnp.arange(batch_tile * spatial)[None, :] // spatial)).astype(jnp.float32)
    bias_row = jnp.full((1, LANE), params["lin_b"][0], jnp.float32)

    return conv_linear_fused(patches, c["w"], c["shift"], wlin_tile, sel, bias_row,
                             spatial=spatial, batch_tile=batch_tile)  # (B, 1) f32


if __name__ == "__main__":
    discriminator_filters, num_layers = 4, 3   # 2 conv blocks: 16 -> 8 -> 4 spatial
    key = jax.random.PRNGKey(0)
    kx, kp = jax.random.split(key)

    x = jax.random.normal(kx, (2, 3, 16, 16), jnp.float32)   # NCHW, like PyTorch
    params = init_params(kp, discriminator_filters, num_layers)

    fwd = jax.jit(lambda inp: discriminator_forward(inp, params))
    out = fwd(x)
    jax.block_until_ready(out)
    assert out.shape == (2, 1) and out.dtype == jnp.float32
    print("KERNEL_OK")
</pallas_src>

<mosaic_0001>
module attributes {stable_mosaic.version = 11 : i64} {
  func.func @_conv_block_kernel(%arg0: i32, %arg1: memref<128x128xbf16, #tpu.memory_space<vmem>>, %arg2: memref<128x128xbf16, #tpu.memory_space<vmem>>, %arg3: memref<1x128xf32, #tpu.memory_space<vmem>>, %arg4: memref<128x128xbf16, #tpu.memory_space<vmem>>) attributes {dimension_semantics = [#tpu.dimension_semantics<parallel>], iteration_bounds = array<i64: 1>, scalar_prefetch = 0 : i64, scratch_operands = 0 : i64, tpu.core_type = #tpu.core_type<tc>, window_params = [{transform_indices = @transform_0, window_bounds = array<i64: 128, 128>}, {pipeline_mode = #tpu.pipeline_mode<synchronous>, transform_indices = @transform_1, window_bounds = array<i64: 128, 128>}, {pipeline_mode = #tpu.pipeline_mode<synchronous>, transform_indices = @transform_2, window_bounds = array<i64: 1, 128>}, {transform_indices = @transform_3, window_bounds = array<i64: 128, 128>}]} {
    %c0 = arith.constant 0 : index
    %c0_0 = arith.constant 0 : index
    %0 = vector.load %arg1[%c0, %c0_0] : memref<128x128xbf16, #tpu.memory_space<vmem>>, vector<128x128xbf16>
    %c0_1 = arith.constant 0 : index
    %c0_2 = arith.constant 0 : index
    %1 = vector.load %arg2[%c0_1, %c0_2] : memref<128x128xbf16, #tpu.memory_space<vmem>>, vector<128x128xbf16>
    %cst = arith.constant dense<0.000000e+00> : vector<128x128xf32>
    %2 = tpu.matmul %0, %1, %cst {dimension_numbers = #tpu.dot_dimension_numbers<[1], [0], [0], [1], [0, 0, 1, 1], [], []>} : vector<128x128xbf16>, vector<128x128xbf16>, vector<128x128xf32> -> vector<128x128xf32>
    %c0_3 = arith.constant 0 : index
    %c0_4 = arith.constant 0 : index
    %3 = vector.load %arg3[%c0_3, %c0_4] : memref<1x128xf32, #tpu.memory_space<vmem>>, vector<1x128xf32>
    %4 = vector.broadcast %3 : vector<1x128xf32> to vector<128x128xf32>
    %5 = arith.addf %2, %4 : vector<128x128xf32>
    %cst_5 = arith.constant 0.000000e+00 : f32
    %6 = vector.broadcast %cst_5 : f32 to vector<128x128xf32>
    %7 = arith.cmpf ogt, %5, %6 : vector<128x128xf32>
    %cst_6 = arith.constant 2.000000e-01 : f32
    %8 = vector.broadcast %cst_6 : f32 to vector<128x128xf32>
    %9 = arith.mulf %8, %5 : vector<128x128xf32>
    %10 = arith.select %7, %5, %9 : vector<128x128xi1>, vector<128x128xf32>
    %11 = arith.truncf %10 : vector<128x128xf32> to vector<128x128xbf16>
    %c0_7 = arith.constant 0 : index
    %c0_8 = arith.constant 0 : index
    %12 = vector.load %arg4[%c0_7, %c0_8] : memref<128x128xbf16, #tpu.memory_space<vmem>>, vector<128x128xbf16>
    tpu.vector_store %arg4[%c0_7, %c0_8], %11 {strides = array<i32>} : memref<128x128xbf16, #tpu.memory_space<vmem>>, vector<128x128xbf16>,
    return
  }
  func.func @transform_0(%arg0: i32) -> (i32, i32) {
    %c0_i32 = arith.constant 0 : i32
    %c0_i32_0 = arith.constant 0 : i32
    return %arg0, %c0_i32 : i32, i32
  }
  func.func @transform_1(%arg0: i32) -> (i32, i32) {
    %c0_i32 = arith.constant 0 : i32
    %c0_i32_0 = arith.constant 0 : i32
    %c0_i32_1 = arith.constant 0 : i32
    return %c0_i32, %c0_i32_0 : i32, i32
  }
  func.func @transform_2(%arg0: i32) -> (i32, i32) {
    %c0_i32 = arith.constant 0 : i32
    %c0_i32_0 = arith.constant 0 : i32
    %c0_i32_1 = arith.constant 0 : i32
    return %c0_i32, %c0_i32_0 : i32, i32
  }
  func.func @transform_3(%arg0: i32) -> (i32, i32) {
    %c0_i32 = arith.constant 0 : i32
    %c0_i32_0 = arith.constant 0 : i32
    return %arg0, %c0_i32 : i32, i32
  }
}

module attributes {stable_mosaic.version = 11 : i64} {
  func.func @_conv_linear_kernel(%arg0: i32, %arg1: memref<32x128xbf16, #tpu.memory_space<vmem>>, %arg2: memref<128x128xbf16, #tpu.memory_space<vmem>>, %arg3: memref<1x128xf32, #tpu.memory_space<vmem>>, %arg4: memref<32x128xf32, #tpu.memory_space<vmem>>, %arg5: memref<8x32xf32, #tpu.memory_space<vmem>>, %arg6: memref<1x128xf32, #tpu.memory_space<vmem>>, %arg7: memref<8x128xf32, #tpu.memory_space<vmem>>) attributes {dimension_semantics = [#tpu.dimension_semantics<parallel>], iteration_bounds = array<i64: 1>, scalar_prefetch = 0 : i64, scratch_operands = 0 : i64, tpu.core_type = #tpu.core_type<tc>, window_params = [{transform_indices = @transform_0, window_bounds = array<i64: 32, 128>}, {pipeline_mode = #tpu.pipeline_mode<synchronous>, transform_indices = @transform_1, window_bounds = array<i64: 128, 128>}, {pipeline_mode = #tpu.pipeline_mode<synchronous>, transform_indices = @transform_2, window_bounds = array<i64: 1, 128>}, {pipeline_mode = #tpu.pipeline_mode<synchronous>, transform_indices = @transform_3, window_bounds = array<i64: 32, 128>}, {pipeline_mode = #tpu.pipeline_mode<synchronous>, transform_indices = @transform_4, window_bounds = array<i64: 8, 32>}, {pipeline_mode = #tpu.pipeline_mode<synchronous>, transform_indices = @transform_5, window_bounds = array<i64: 1, 128>}, {transform_indices = @transform_6, window_bounds = array<i64: 8, 128>}]} {
    %c0 = arith.constant 0 : index
    %c0_0 = arith.constant 0 : index
    %0 = vector.load %arg1[%c0, %c0_0] : memref<32x128xbf16, #tpu.memory_space<vmem>>, vector<32x128xbf16>
    %c0_1 = arith.constant 0 : index
    %c0_2 = arith.constant 0 : index
    %1 = vector.load %arg2[%c0_1, %c0_2] : memref<128x128xbf16, #tpu.memory_space<vmem>>, vector<128x128xbf16>
    %cst = arith.constant dense<0.000000e+00> : vector<32x128xf32>
    %2 = tpu.matmul %0, %1, %cst {dimension_numbers = #tpu.dot_dimension_numbers<[1], [0], [0], [1], [0, 0, 1, 1], [], []>} : vector<32x128xbf16>, vector<128x128xbf16>, vector<32x128xf32> -> vector<32x128xf32>
    %c0_3 = arith.constant 0 : index
    %c0_4 = arith.constant 0 : index
    %3 = vector.load %arg3[%c0_3, %c0_4] : memref<1x128xf32, #tpu.memory_space<vmem>>, vector<1x128xf32>
    %4 = vector.broadcast %3 : vector<1x128xf32> to vector<32x128xf32>
    %5 = arith.addf %2, %4 : vector<32x128xf32>
    %cst_5 = arith.constant 0.000000e+00 : f32
    %6 = vector.broadcast %cst_5 : f32 to vector<32x128xf32>
    %7 = arith.cmpf ogt, %5, %6 : vector<32x128xf32>
    %cst_6 = arith.constant 2.000000e-01 : f32
    %8 = vector.broadcast %cst_6 : f32 to vector<32x128xf32>
    %9 = arith.mulf %8, %5 : vector<32x128xf32>
    %10 = arith.select %7, %5, %9 : vector<32x128xi1>, vector<32x128xf32>
    %c0_7 = arith.constant 0 : index
    %c0_8 = arith.constant 0 : index
    %11 = vector.load %arg4[%c0_7, %c0_8] : memref<32x128xf32, #tpu.memory_space<vmem>>, vector<32x128xf32>
    %12 = arith.mulf %10, %11 : vector<32x128xf32>
    %c0_9 = arith.constant 0 : index
    %c0_10 = arith.constant 0 : index
    %13 = vector.load %arg5[%c0_9, %c0_10] : memref<8x32xf32, #tpu.memory_space<vmem>>, vector<8x32xf32>
    %cst_11 = arith.constant dense<0.000000e+00> : vector<8x128xf32>
    %14 = tpu.matmul %13, %12, %cst_11 {dimension_numbers = #tpu.dot_dimension_numbers<[1], [0], [0], [1], [0, 0, 1, 1], [], []>} : vector<8x32xf32>, vector<32x128xf32>, vector<8x128xf32> -> vector<8x128xf32>
    %cst_12 = arith.constant dense<0.000000e+00> : vector<8xf32>
    %15 = vector.multi_reduction <add>, %14, %cst_12 [1] : vector<8x128xf32> to vector<8xf32>
    %16 = vector.shape_cast %15 : vector<8xf32> to vector<8x1xf32>
    %c0_13 = arith.constant 0 : index
    %c0_14 = arith.constant 0 : index
    %17 = vector.load %arg6[%c0_13, %c0_14] : memref<1x128xf32, #tpu.memory_space<vmem>>, vector<1x128xf32>
    %18 = vector.broadcast %16 : vector<8x1xf32> to vector<8x128xf32>
    %19 = vector.broadcast %17 : vector<1x128xf32> to vector<8x128xf32>
    %20 = arith.addf %18, %19 : vector<8x128xf32>
    %c0_15 = arith.constant 0 : index
    %c0_16 = arith.constant 0 : index
    %21 = vector.load %arg7[%c0_15, %c0_16] : memref<8x128xf32, #tpu.memory_space<vmem>>, vector<8x128xf32>
    tpu.vector_store %arg7[%c0_15, %c0_16], %20 {strides = array<i32>} : memref<8x128xf32, #tpu.memory_space<vmem>>, vector<8x128xf32>,
    return
  }
  func.func @transform_0(%arg0: i32) -> (i32, i32) {
    %c0_i32 = arith.constant 0 : i32
    %c0_i32_0 = arith.constant 0 : i32
    return %arg0, %c0_i32 : i32, i32
  }
  func.func @transform_1(%arg0: i32) -> (i32, i32) {
    %c0_i32 = arith.constant 0 : i32
    %c0_i32_0 = arith.constant 0 : i32
    %c0_i32_1 = arith.constant 0 : i32
    return %c0_i32, %c0_i32_0 : i32, i32
  }
  func.func @transform_2(%arg0: i32) -> (i32, i32) {
    %c0_i32 = arith.constant 0 : i32
    %c0_i32_0 = arith.constant 0 : i32
    %c0_i32_1 = arith.constant 0 : i32
    return %c0_i32, %c0_i32_0 : i32, i32
  }
  func.func @transform_3(%arg0: i32) -> (i32, i32) {
    %c0_i32 = arith.constant 0 : i32
    %c0_i32_0 = arith.constant 0 : i32
    %c0_i32_1 = arith.constant 0 : i32
    return %c0_i32, %c0_i32_0 : i32, i32
  }
  func.func @transform_4(%arg0: i32) -> (i32, i32) {
    %c0_i32 = arith.constant 0 : i32
    %c0_i32_0 = arith.constant 0 : i32
    %c0_i32_1 = arith.constant 0 : i32
    return %c0_i32, %c0_i32_0 : i32, i32
  }
  func.func @transform_5(%arg0: i32) -> (i32, i32) {
    %c0_i32 = arith.constant 0 : i32
    %c0_i32_0 = arith.constant 0 : i32
    %c0_i32_1 = arith.constant 0 : i32
    return %c0_i32, %c0_i32_0 : i32, i32
  }
  func.func @transform_6(%arg0: i32) -> (i32, i32) {
    %c0_i32 = arith.constant 0 : i32
    %c0_i32_0 = arith.constant 0 : i32
    return %arg0, %c0_i32 : i32, i32
  }
}

</mosaic_0001>

<bundles_post_ra>
// kernel: _lambda_.2
= control target key start
LH: loop header
LB: loop body
LE: loop exit
PB: predicated region body
PF: predicated region fallthrough
CT: control target
= control target key end

     0   :  { %s672_s1 = inlined_call_operand.vmem [shape: bf16[128,128], index: 1, kind: input, shape index: {}]   ;;  %s673_s0 = inlined_call_operand.vmem [shape: bf16[128,128], index: 0, kind: input, shape index: {}]   ;;  %s674_s2 = inlined_call_operand.vmem [shape: f32[1,128], index: 2, kind: input, shape index: {}]   ;;  %s675_s3 = inlined_call_operand.vmem [shape: bf16[128,128], index: 3, kind: output, shape index: {}]  }
   0x1   :  { %v539_v0 = vld [vmem:[%s672_s1] sm:$0xff]   ;;  %v540_v1 = vld [vmem:[%s672_s1 + $0x8] sm:$0xff]   ;;  %v541_v2 = vld [vmem:[%s672_s1 + $0x10] sm:$0xff]  }
   0x2   :  { %491 = vmatprep.subr.bf16.mxu0 %v539_v0  ;;  %523 = vmatprep.subr.bf16.mxu1 %v539_v0  ;;  %v542_v3 = vld [vmem:[%s672_s1 + $0x18] sm:$0xff]   ;;  %v547_v4 = vld [vmem:[%s673_s0] sm:$0xff]   ;;  %v544_v7 = vld [vmem:[%s672_s1 + $0x28] sm:$0xff]  }
   0x3   :  { %492 = vmatpush3.bf16.msra.mxu0 %v539_v0  ;;  %531 = vmatpush3.bf16.msra.mxu1 %v539_v0  ;;  %v548_v5 = vld [vmem:[%s673_s0 + $0x20] sm:$0xff]   ;;  %v545_v8 = vld [vmem:[%s672_s1 + $0x30] sm:$0xff]   ;;  %v546_v9 = vld [vmem:[%s672_s1 + $0x38] sm:$0xff]  }
   0x4   :  { %493 = vmatprep.subr.bf16.mxu0 %v540_v1  ;;  %524 = vmatprep.subr.bf16.mxu1 %v540_v1  ;;  %v543_v6 = vld [vmem:[%s672_s1 + $0x20] sm:$0xff]   ;;  %v549_v10 = vld [vmem:[%s673_s0 + $0x8] sm:$0xff]   ;;  %v551_v12 = vld [vmem:[%s673_s0 + $0x10] sm:$0xff]  }
   0x5   :  { %507 = vmatprep.mubr.bf16.mxu0 %v547_v4  ;;  %515 = vmatprep.mubr.bf16.mxu1 %v548_v5  ;;  %v550_v11 = vld [vmem:[%s673_s0 + $0x28] sm:$0xff]   ;;  %v552_v13 = vld [vmem:[%s673_s0 + $0x30] sm:$0xff]   ;;  %v553_v14 = vld [vmem:[%s673_s0 + $0x18] sm:$0xff]  }
   0x6   :  { %v554_v15 = vld [vmem:[%s673_s0 + $0x38] sm:$0xff]   ;;  %v626_v16 = vld [vmem:[%s674_s2] ss:$0 sm:$0xff] }
   0x7   :  { %494 = vmatpush3.bf16.msra.mxu0 %v540_v1  ;;  %532 = vmatpush3.bf16.msra.mxu1 %v540_v1 }
   0x8   :  { %495 = vmatprep.subr.bf16.mxu0 %v541_v2  ;;  %525 = vmatprep.subr.bf16.mxu1 %v541_v2 }
   0xb   :  { %496 = vmatpush3.bf16.msra.mxu0 %v541_v2  ;;  %533 = vmatpush3.bf16.msra.mxu1 %v541_v2 }
   0xc   :  { %497 = vmatprep.subr.bf16.mxu0 %v542_v3  ;;  %526 = vmatprep.subr.bf16.mxu1 %v542_v3 }
   0xf   :  { %498 = vmatpush3.bf16.msra.mxu0 %v542_v3  ;;  %534 = vmatpush3.bf16.msra.mxu1 %v542_v3 }
  0x10   :  { %499 = vmatprep.subr.bf16.mxu0 %v543_v6  ;;  %527 = vmatprep.subr.bf16.mxu1 %v543_v6 }
  0x13   :  { %500 = vmatpush3.bf16.msra.mxu0 %v543_v6  ;;  %535 = vmatpush3.bf16.msra.mxu1 %v543_v6 }
  0x14   :  { %501 = vmatprep.subr.bf16.mxu0 %v544_v7  ;;  %528 = vmatprep.subr.bf16.mxu1 %v544_v7 }
  0x17   :  { %502 = vmatpush3.bf16.msra.mxu0 %v544_v7  ;;  %536 = vmatpush3.bf16.msra.mxu1 %v544_v7 }
  0x18   :  { %503 = vmatprep.subr.bf16.mxu0 %v545_v8  ;;  %529 = vmatprep.subr.bf16.mxu1 %v545_v8 }
  0x1b   :  { %504 = vmatpush3.bf16.msra.mxu0 %v545_v8  ;;  %537 = vmatpush3.bf16.msra.mxu1 %v545_v8 }
  0x1c   :  { %505 = vmatprep.subr.bf16.mxu0 %v546_v9  ;;  %530 = vmatprep.subr.bf16.mxu1 %v546_v9 }
  0x1f   :  { %506 = vmatpush3.bf16.msra.mxu0 %v546_v9  ;;  %538 = vmatpush3.bf16.msra.mxu1 %v546_v9 }
  0x22   :  { %508 = vmatmul.mubr.bf16.vlgmr.msra.gmra.mrb[0].mxu0 %v549_v10  ;;  %516 = vmatmul.mubr.bf16.vlgmr.msra.gmra.mrb[0].mxu1 %v550_v11 }
  0x23   :  { %511 = vmatprep.mubr.bf16.mxu0 %v551_v12  ;;  %519 = vmatprep.mubr.bf16.mxu1 %v552_v13 }
  0x2a   :  { %512 = vmatmul.mubr.bf16.gmra.mrb[4].mxu0 %v553_v14  ;;  %520 = vmatmul.mubr.bf16.gmra.mrb[4].mxu1 %v554_v15 }
  0xf5   :  { %v509_v17 = vpop.f32.mrb[0].mxu0  ;;  %v517_v18 = vpop.f32.mrb[0].mxu1 }
  0xf6   :  { %v193_v19 = vadd.f32 %v509_v17, %v626_v16  ;;  %v225_v20 = vadd.f32 %v517_v18, %v626_v16  ;;  %v184_v21 = vpop.f32.mrb[1].mxu0  ;;  %v216_v22 = vpop.f32.mrb[1].mxu1 }
  0xf7   :  { %v185_v23 = vadd.f32 %v626_v16, %v184_v21  ;;  %v217_v24 = vadd.f32 %v626_v16, %v216_v22  ;;  %v510_v25 = vpop.f32.mrb[2].mxu0  ;;  %v518_v26 = vpop.f32.mrb[2].mxu1 }
  0xf8   :  { %vm249_vm0 = vcmp.gt.f32.partialorder %v193_v19, 0.0  ;;  %v265_v27 = vmul.f32 0.2, %v193_v19  ;;  %vm257_vm1 = vcmp.gt.f32.partialorder %v225_v20, 0.0  ;;  %v273_v28 = vmul.f32 0.2, %v225_v20 }
  0xf9   :  { %vm247_vm2 = vcmp.gt.f32.partialorder %v185_v23, 0.0  ;;  %v263_v29 = vmul.f32 0.2, %v185_v23  ;;  %vm255_vm3 = vcmp.gt.f32.partialorder %v217_v24, 0.0  ;;  %v271_v30 = vmul.f32 0.2, %v217_v24 }
  0xfa   :  { %v196_v31 = vadd.f32 %v510_v25, %v626_v16  ;;  %v228_v32 = vadd.f32 %v518_v26, %v626_v16  ;;  %v187_v33 = vpop.f32.mrb[3].mxu0  ;;  %v219_v34 = vpop.f32.mrb[3].mxu1  ;;  %v281_v35 = vsel %vm249_vm0, %v193_v19, %v265_v27  ;;  %v289_v36 = vsel %vm257_vm1, %v225_v20, %v273_v28 }
  0xfb   :  { %v188_v37 = vadd.f32 %v626_v16, %v187_v33  ;;  %v220_v38 = vadd.f32 %v626_v16, %v219_v34  ;;  %v279_v43 = vsel %vm247_vm2, %v185_v23, %v263_v29  ;;  %v287_v44 = vsel %vm255_vm3, %v217_v24, %v271_v30 }
  0xfc   :  { %vm250_vm4 = vcmp.gt.f32.partialorder %v196_v31, 0.0  ;;  %v266_v39 = vmul.f32 0.2, %v196_v31  ;;  %vm258_vm5 = vcmp.gt.f32.partialorder %v228_v32, 0.0  ;;  %v274_v40 = vmul.f32 0.2, %v228_v32 }
  0xfd   :  { %vm248_vm6 = vcmp.gt.f32.partialorder %v188_v37, 0.0  ;;  %v264_v41 = vmul.f32 0.2, %v188_v37  ;;  %vm256_vm7 = vcmp.gt.f32.partialorder %v220_v38, 0.0  ;;  %v272_v42 = vmul.f32 0.2, %v220_v38 }
  0xfe   :  { %v282_v45 = vsel %vm250_vm4, %v196_v31, %v266_v39  ;;  %v290_v46 = vsel %vm258_vm5, %v228_v32, %v274_v40  ;;  %v513_v47 = vpop.f32.mrb[4].mxu0  ;;  %v521_v48 = vpop.f32.mrb[4].mxu1 }
  0xff   :  { %v436_v49 = vpack.c.bf16 %v282_v45, %v281_v35  ;;  %v456_v50 = vpack.c.bf16 %v290_v46, %v289_v36  ;;  %v280_v51 = vsel %vm248_vm6, %v188_v37, %v264_v41  ;;  %v288_v52 = vsel %vm256_vm7, %v220_v38, %v272_v42  ;;  %v200_v53 = vpop.f32.mrb[5].mxu0  ;;  %v232_v54 = vpop.f32.mrb[5].mxu1 }
 0x100   :  { %v431_v55 = vpack.c.bf16 %v280_v51, %v279_v43  ;;  %v451_v56 = vpack.c.bf16 %v288_v52, %v287_v44  ;;  %v209_v57 = vadd.f32 %v513_v47, %v626_v16  ;;  %v241_v58 = vadd.f32 %v521_v48, %v626_v16  ;;  %v514_v59 = vpop.f32.mrb[6].mxu0  ;;  %v522_v60 = vpop.f32.mrb[6].mxu1 }
 0x101   :  { %468 = vst [vmem:[%s675_s3 + $0x8] sm:$0xff] %v436_v49   ;;  %472 = vst [vmem:[%s675_s3 + $0x28] sm:$0xff] %v456_v50   ;;  %v201_v61 = vadd.f32 %v626_v16, %v200_v53  ;;  %v233_v62 = vadd.f32 %v626_v16, %v232_v54  ;;  %v212_v63 = vadd.f32 %v514_v59, %v626_v16  ;;  %v203_v1 = vpop.f32.mrb[7].mxu0  ;;  %v235_v2 = vpop.f32.mrb[7].mxu1 }
 0x102   :  { %v244_v0 = vadd.f32 %v522_v60, %v626_v16  ;;  %432 = vst [vmem:[%s675_s3] sm:$0xff] %v431_v55   ;;  %471 = vst [vmem:[%s675_s3 + $0x20] sm:$0xff] %v451_v56   ;;  %v269_v3 = vmul.f32 0.2, %v209_v57  ;;  %vm253_vm8 = vcmp.gt.f32.partialorder %v209_v57, 0.0  ;;  %v277_v4 = vmul.f32 0.2, %v241_v58 }
 0x103   :  { %vm261_vm9 = vcmp.gt.f32.partialorder %v241_v58, 0.0  ;;  %vm251_vm10 = vcmp.gt.f32.partialorder %v201_v61, 0.0  ;;  %vm254_vm11 = vcmp.gt.f32.partialorder %v212_v63, 0.0  ;;  %v270_v5 = vmul.f32 0.2, %v212_v63 }
 0x104   :  { %v267_v6 = vmul.f32 0.2, %v201_v61  ;;  %vm259_vm12 = vcmp.gt.f32.partialorder %v233_v62, 0.0  ;;  %vm262_vm13 = vcmp.gt.f32.partialorder %v244_v0, 0.0  ;;  %v278_v7 = vmul.f32 0.2, %v244_v0 }
 0x105   :  { %v285_v8 = vsel %vm253_vm8, %v209_v57, %v269_v3  ;;  %v286_v9 = vsel %vm254_vm11, %v212_v63, %v270_v5  ;;  %v204_v10 = vadd.f32 %v626_v16, %v203_v1  ;;  %v236_v11 = vadd.f32 %v626_v16, %v235_v2 }
 0x106   :  { %v293_v12 = vsel %vm261_vm9, %v241_v58, %v277_v4  ;;  %v275_v13 = vmul.f32 0.2, %v233_v62  ;;  %v446_v14 = vpack.c.bf16 %v286_v9, %v285_v8  ;;  %v294_v15 = vsel %vm262_vm13, %v244_v0, %v278_v7 }
 0x107   :  { %v466_v17 = vpack.c.bf16 %v294_v15, %v293_v12  ;;  %vm252_vm14 = vcmp.gt.f32.partialorder %v204_v10, 0.0  ;;  %v268_v18 = vmul.f32 0.2, %v204_v10  ;;  %vm260_vm15 = vcmp.gt.f32.partialorder %v236_v11, 0.0 }
 0x108   :  { %470 = vst [vmem:[%s675_s3 + $0x18] sm:$0xff] %v446_v14   ;;  %v276_v19 = vmul.f32 0.2, %v236_v11  ;;  %v283_v20 = vsel %vm251_vm10, %v201_v61, %v267_v6  ;;  %v291_v21 = vsel %vm259_vm12, %v233_v62, %v275_v13 }
 0x109   :  { %474 = vst [vmem:[%s675_s3 + $0x38] sm:$0xff] %v466_v17   ;;  %v284_v16 = vsel %vm252_vm14, %v204_v10, %v268_v18 }
 0x10a   :  { %v441_v22 = vpack.c.bf16 %v284_v16, %v283_v20  ;;  %v292_v23 = vsel %vm260_vm15, %v236_v11, %v276_v19 }
 0x10b   :  { %v461_v24 = vpack.c.bf16 %v292_v23, %v291_v21 }
 0x10c   :  { %469 = vst [vmem:[%s675_s3 + $0x10] sm:$0xff] %v441_v22  }
 0x10d   :  { %473 = vst [vmem:[%s675_s3 + $0x30] sm:$0xff] %v461_v24  }

// kernel: _lambda_.3
= control target key start
LH: loop header
LB: loop body
LE: loop exit
PB: predicated region body
PF: predicated region fallthrough
CT: control target
= control target key end

     0   :  { %v348_v10 = vmov 0.0|0.0   ;;  %vm349_vm0 = vmmov 0   ;;  %v350_v11 = vmov 0.0   ;;  %vm181_vm5 = vcmask 261120   ;;  %s440_s1 = inlined_call_operand.vmem [shape: bf16[128,128], index: 1, kind: input, shape index: {}]   ;;  %s441_s0 = inlined_call_operand.vmem [shape: bf16[32,128], index: 0, kind: input, shape index: {}]   ;;  %s442_s2 = inlined_call_operand.vmem [shape: f32[1,128], index: 2, kind: input, shape index: {}]   ;;  %s443_s3 = inlined_call_operand.vmem [shape: f32[32,128], index: 3, kind: input, shape index: {}]   ;;  %s444_s4 = inlined_call_operand.vmem [shape: f32[8,32], index: 4, kind: input, shape index: {}]   ;;  %s445_s5 = inlined_call_operand.vmem [shape: f32[1,128], index: 5, kind: input, shape index: {}]   ;;  %s446_s6 = inlined_call_operand.vmem [shape: f32[8,128], index: 6, kind: output, shape index: {}]  }
   0x1   :  { %v338_v0 = vld [vmem:[%s440_s1] sm:$0xff]   ;;  %v339_v1 = vld [vmem:[%s440_s1 + $0x8] sm:$0xff]   ;;  %v340_v2 = vld [vmem:[%s440_s1 + $0x10] sm:$0xff]   ;;  %329 = vmatprep.subr.bf16.mxu1 %v348_v10  ;;  %326 = vmatprep.mubr.msk.f32.mxu1 %vm349_vm0, %v350_v11 }
   0x2   :  { %298 = vmatprep.subr.bf16.mxu0 %v338_v0  ;;  %v341_v3 = vld [vmem:[%s440_s1 + $0x18] sm:$0xff]   ;;  %v346_v4 = vld [vmem:[%s441_s0] sm:$0xff]   ;;  %v343_v6 = vld [vmem:[%s440_s1 + $0x28] sm:$0xff]  }
   0x3   :  { %299 = vmatpush3.bf16.msra.mxu0 %v338_v0  ;;  %314 = vmatprep.mubr.bf16.mxu0 %v346_v4  ;;  %v342_v5 = vld [vmem:[%s440_s1 + $0x20] sm:$0xff]   ;;  %v344_v7 = vld [vmem:[%s440_s1 + $0x30] sm:$0xff]   ;;  %v345_v8 = vld [vmem:[%s440_s1 + $0x38] sm:$0xff]  }
   0x4   :  { %300 = vmatprep.subr.bf16.mxu0 %v339_v1  ;;  %v347_v9 = vld [vmem:[%s441_s0 + $0x8] sm:$0xff]   ;;  %v270_v12 = vld [vmem:[%s442_s2] ss:$0 sm:$0xff]  ;;  %v174_v25 = vld [vmem:[%s443_s3 + $0x10] sm:$0xff] }
   0x5   :  { %v175_v26 = vld [vmem:[%s443_s3 + $0x18] sm:$0xff]  ;;  %v172_v29 = vld [vmem:[%s443_s3] sm:$0xff]  ;;  %v173_v30 = vld [vmem:[%s443_s3 + $0x8] sm:$0xff] }
   0x6   :  { %v180_v39 = vld [vmem:[%s444_s4] sm:$0xff] }
   0x7   :  { %301 = vmatpush3.bf16.msra.mxu0 %v339_v1  ;;  %v282_v42 = vld [vmem:[%s445_s5] ss:$0 sm:$0xff] }
   0x8   :  { %302 = vmatprep.subr.bf16.mxu0 %v340_v2 }
   0xb   :  { %303 = vmatpush3.bf16.msra.mxu0 %v340_v2 }
   0xc   :  { %304 = vmatprep.subr.bf16.mxu0 %v341_v3 }
   0xf   :  { %305 = vmatpush3.bf16.msra.mxu0 %v341_v3 }
  0x10   :  { %306 = vmatprep.subr.bf16.mxu0 %v342_v5 }
  0x13   :  { %307 = vmatpush3.bf16.msra.mxu0 %v342_v5 }
  0x14   :  { %308 = vmatprep.subr.bf16.mxu0 %v343_v6 }
  0x17   :  { %309 = vmatpush3.bf16.msra.mxu0 %v343_v6 }
  0x18   :  { %310 = vmatprep.subr.bf16.mxu0 %v344_v7 }
  0x1b   :  { %311 = vmatpush3.bf16.msra.mxu0 %v344_v7 }
  0x1c   :  { %312 = vmatprep.subr.bf16.mxu0 %v345_v8 }
  0x1f   :  { %313 = vmatpush3.bf16.msra.mxu0 %v345_v8 }
  0x22   :  { %315 = vmatmul.mubr.bf16.vlgmr.msra.gmra.mrb[0].mxu0 %v347_v9 }
  0xf5   :  { %v316_v13 = vpop.f32.mrb[0].mxu0 }
  0xf6   :  { %v154_v14 = vadd.f32 %v316_v13, %v270_v12  ;;  %v145_v15 = vpop.f32.mrb[1].mxu0 }
  0xf7   :  { %v146_v16 = vadd.f32 %v270_v12, %v145_v15  ;;  %v317_v17 = vpop.f32.mrb[2].mxu0 }
  0xf8   :  { %vm162_vm1 = vcmp.gt.f32.partialorder %v154_v14, 0.0  ;;  %v166_v18 = vmul.f32 0.2, %v154_v14  ;;  %v157_v19 = vadd.f32 %v317_v17, %v270_v12  ;;  %v148_v20 = vpop.f32.mrb[3].mxu0 }
  0xf9   :  { %vm160_vm2 = vcmp.gt.f32.partialorder %v146_v16, 0.0  ;;  %v164_v21 = vmul.f32 0.2, %v146_v16  ;;  %v149_v22 = vadd.f32 %v270_v12, %v148_v20 }
  0xfa   :  { %v170_v23 = vsel %vm162_vm1, %v154_v14, %v166_v18  ;;  %vm163_vm3 = vcmp.gt.f32.partialorder %v157_v19, 0.0  ;;  %v167_v24 = vmul.f32 0.2, %v157_v19 }
  0xfb   :  { %vm161_vm4 = vcmp.gt.f32.partialorder %v149_v22, 0.0  ;;  %v165_v27 = vmul.f32 0.2, %v149_v22  ;;  %v168_v28 = vsel %vm160_vm2, %v146_v16, %v164_v21  ;;  %v178_v33 = vmul.f32 %v174_v25, %v170_v23 }
  0xfc   :  { %v171_v31 = vsel %vm163_vm3, %v157_v19, %v167_v24  ;;  %v176_v35 = vmul.f32 %v172_v29, %v168_v28 }
  0xfd   :  { %v169_v32 = vsel %vm161_vm4, %v149_v22, %v165_v27  ;;  %v179_v34 = vmul.f32 %v175_v26, %v171_v31 }
  0xfe   :  { %v177_v36 = vmul.f32 %v173_v30, %v169_v32 }
  0xff   :  { %v333_v37 = vpack.c.bf16 %v179_v34, %v178_v33 }
 0x100   :  { %v330_v38 = vpack.c.bf16 %v177_v36, %v176_v35 }
 0x102   :  { %331 = vmatpush3.bf16.msra.mxu1 %v330_v38 }
 0x103   :  { %332 = vmatprep.subr.bf16.mxu1 %v348_v10 }
 0x106   :  { %334 = vmatpush3.bf16.msra.mxu1 %v333_v37 }
 0x109   :  { %327 = vmatmul.mubr.msk.f32.vlgmr.msra.gmra.mrb[0].mxu1 %vm181_vm5, %v180_v39 }
 0x1dc   :  { %v251_v40 = vpop.f32.mrb[0].mxu1 }
 0x1dd   :  { %v328_v41 = vpop.f32.mrb[1].mxu1  ;;  %255 = vadd.xlane.f32.xlu0 %v251_v40 }
 0x26a   :  { %v256_v43 = vpop.xlane.xlu0 %255 }
 0x26b   :  { %v264_v44 = vadd.f32 %v282_v42, %v256_v43 }
 0x26d   :  { %265 = vst [vmem:[%s446_s6] sm:$0xff] %v264_v44 }

</bundles_post_ra>
